<compile_context>
chip_gen: v7x
topology: tpu7x:2x2x1
jax: 0.10.0
libtpu: 0.0.40
codegen_flags: <defaults>
</compile_context>

<pallas_src>
import functools

import jax
import jax.numpy as jnp
from jax.experimental import pallas as pl
from jax.experimental.pallas import tpu as pltpu


def _bn_stats_kernel(x_ref, gamma_ref, beta_ref, scale_ref, shift_ref, *, eps):
    """Per-channel BN scale/shift from batch statistics.

    x_ref    : (N, C, H*W) f32   spatial on lanes
    gamma_ref: (C, 1) f32
    beta_ref : (C, 1) f32
    scale_ref: (C, 1) f32 out    gamma / sqrt(var + eps)
    shift_ref: (C, 1) f32 out    beta - mean * scale
    """
    N, C, HW = x_ref.shape
    x = x_ref[...]
    inv_count = 1.0 / float(N * HW)

    # Two-pass (mean, then centered variance): robust to non-zero-centered
    # inputs (review flagged E[x^2]-mean^2 cancellation).  x is tiny here.
    row_sum = jnp.sum(x, axis=2, keepdims=True)                   # (N, C, 1)
    tot = row_sum[0]
    for n in range(1, N):
        tot = tot + row_sum[n]
    mean = tot * inv_count                                        # (C, 1)

    centered = x - mean                                           # (N, C, HW)
    sq_sum = jnp.sum(centered * centered, axis=2, keepdims=True)  # (N, C, 1)
    tot2 = sq_sum[0]
    for n in range(1, N):
        tot2 = tot2 + sq_sum[n]
    var = tot2 * inv_count                                        # (C, 1)

    scale = gamma_ref[...] * jax.lax.rsqrt(var + eps)
    scale_ref[...] = scale
    shift_ref[...] = beta_ref[...] - mean * scale


def _conv_kernel(x_ref, w_ref, b_ref, scale_ref, shift_ref, o_ref, col_ref,
                 *, H, W):
    """Fused BN-apply + ReLU + 3x3 same-conv for one image (grid over batch).

    x_ref    : (C, H*W)   f32   one image, spatial on lanes
    w_ref    : (O, 9*C)   f32   conv weight, cols ordered (ky, kx, c)
    b_ref    : (O, 1)     f32
    scale_ref: (C, 1)     f32   BN scale
    shift_ref: (C, 1)     f32   BN shift
    o_ref    : (O, H*W)   f32   lane-dense output
    col_ref  : (9*C, H*W) f32   im2col scratch (VMEM)
    """
    C, HW = x_ref.shape

    # BatchNorm (precomputed per-channel affine) + ReLU.
    xr = jnp.maximum(x_ref[...] * scale_ref[...] + shift_ref[...], 0.0)

    # Output-pixel coordinates along the lane axis.
    pos = jax.lax.broadcasted_iota(jnp.int32, (1, HW), 1)
    hrow = pos // W
    wcol = pos % W

    # Build the 9 shifted taps with lane rolls (XLU) + halo masks; no padded
    # scratch tensor, no per-tap relayout copies.
    for k in range(9):
        dy, dx = k // 3 - 1, k % 3 - 1
        s = dy * W + dx
        tap = xr if s == 0 else pltpu.roll(xr, (-s) % HW, axis=1)
        conds = []
        if dy == -1:
            conds.append(hrow >= 1)
        elif dy == 1:
            conds.append(hrow <= H - 2)
        if dx == -1:
            conds.append(wcol >= 1)
        elif dx == 1:
            conds.append(wcol <= W - 2)
        if conds:
            mask = conds[0]
            for extra in conds[1:]:
                mask = jnp.logical_and(mask, extra)
            tap = jnp.where(mask, tap, 0.0)
        col_ref[k * C:(k + 1) * C, :] = tap

    # Single im2col matmul: (O, 9C) x (9C, HW).  With O=4 the MXU is
    # under-utilized (review: batch several heads to fill it); acceptable for
    # a single head at this size.
    o_ref[...] = (
        jnp.dot(w_ref[...], col_ref[...], preferred_element_type=jnp.float32)
        + b_ref[...]
    )


def base_learner_forward(x_nchw, wt, bias, gamma=None, beta=None, eps=1e-5):
    """x_nchw: (N, C, H, W); wt: (O, C, 3, 3) OIHW; bias: (O,);
    gamma/beta: (C,) BN affine params (default = PyTorch init 1/0)."""
    N, C, H, W = x_nchw.shape
    O = wt.shape[0]
    HW = H * W

    if gamma is None:
        gamma = jnp.ones((C,), jnp.float32)
    if beta is None:
        beta = jnp.zeros((C,), jnp.float32)

    # Free reshapes only -- data stays NCHW-contiguous (no HBM transposes).
    x3 = x_nchw.reshape(N, C, HW).astype(jnp.float32)
    g2 = gamma.reshape(C, 1).astype(jnp.float32)
    bt2 = beta.reshape(C, 1).astype(jnp.float32)

    # --- BN batch statistics (tiny kernel, whole batch resident) ---
    scale, shift = pl.pallas_call(
        functools.partial(_bn_stats_kernel, eps=eps),
        out_shape=(
            jax.ShapeDtypeStruct((C, 1), jnp.float32),
            jax.ShapeDtypeStruct((C, 1), jnp.float32),
        ),
        in_specs=[
            pl.BlockSpec(memory_space=pltpu.MemorySpace.VMEM),
            pl.BlockSpec(memory_space=pltpu.MemorySpace.VMEM),
            pl.BlockSpec(memory_space=pltpu.MemorySpace.VMEM),
        ],
        out_specs=(
            pl.BlockSpec(memory_space=pltpu.MemorySpace.VMEM),
            pl.BlockSpec(memory_space=pltpu.MemorySpace.VMEM),
        ),
    )(x3, g2, bt2)

    # Conv weight: OIHW -> (O, (ky, kx, c)) matching the im2col row order.
    w2 = jnp.transpose(wt, (0, 2, 3, 1)).reshape(O, 9 * C).astype(jnp.float32)
    b2 = bias.reshape(O, 1).astype(jnp.float32)

    # --- BN-apply + ReLU + conv, gridded over the batch ---
    # For larger shapes, additionally tile H-row blocks (1-row halo) and set
    # pltpu.CompilerParams(vmem_limit_bytes=...); unnecessary at this size
    # (per-image working set ~50 KiB).
    out3 = pl.pallas_call(
        functools.partial(_conv_kernel, H=H, W=W),
        out_shape=jax.ShapeDtypeStruct((N, O, HW), jnp.float32),
        grid=(N,),
        in_specs=[
            pl.BlockSpec((None, C, HW), lambda n: (n, 0, 0)),
            pl.BlockSpec((O, 9 * C), lambda n: (0, 0)),
            pl.BlockSpec((O, 1), lambda n: (0, 0)),
            pl.BlockSpec((C, 1), lambda n: (0, 0)),
            pl.BlockSpec((C, 1), lambda n: (0, 0)),
        ],
        out_specs=pl.BlockSpec((None, O, HW), lambda n: (n, 0, 0)),
        scratch_shapes=[pltpu.VMEM((9 * C, HW), jnp.float32)],
        compiler_params=pltpu.CompilerParams(
            dimension_semantics=("parallel",)),
    )(x3, w2, b2, scale, shift)

    return out3.reshape(N, O, H, W)   # free reshape back to NCHW


def reference_forward(x_nchw, wt, bias, gamma, beta, eps=1e-5):
    """Pure-JAX reference matching PyTorch semantics (correctness check)."""
    mean = jnp.mean(x_nchw, axis=(0, 2, 3), keepdims=True)
    var = jnp.mean((x_nchw - mean) ** 2, axis=(0, 2, 3), keepdims=True)
    xhat = (x_nchw - mean) / jnp.sqrt(var + eps)
    xr = jnp.maximum(xhat * gamma.reshape(1, -1, 1, 1)
                     + beta.reshape(1, -1, 1, 1), 0.0)
    y = jax.lax.conv_general_dilated(
        xr, wt, window_strides=(1, 1), padding=((1, 1), (1, 1)),
        dimension_numbers=("NCHW", "OIHW", "NCHW"))
    return y + bias.reshape(1, -1, 1, 1)


if __name__ == "__main__":
    # args.way = 4, args.num_classes = 4 (small synthetic config)
    way, num_classes = 4, 4
    N, H, W = 2, 16, 16

    key = jax.random.PRNGKey(0)
    x = jax.random.normal(key, (N, num_classes, H, W), dtype=jnp.float32)

    # Parameters exactly as in BaseLearner.__init__ / nn.BatchNorm2d init:
    wt = jnp.ones((way, num_classes, 3, 3), dtype=jnp.float32)
    bias = jnp.zeros((way,), dtype=jnp.float32)
    gamma = jnp.ones((num_classes,), dtype=jnp.float32)
    beta = jnp.zeros((num_classes,), dtype=jnp.float32)

    out = base_learner_forward(x, wt, bias, gamma, beta)
    out = jax.block_until_ready(out)

    assert out.shape == (N, way, H, W), out.shape
    ref = reference_forward(x, wt, bias, gamma, beta)
    max_err = float(jnp.max(jnp.abs(out - ref)))
    assert jnp.allclose(out, ref, atol=1e-3, rtol=1e-3), f"max_err={max_err}"

    print("KERNEL_OK")
</pallas_src>

<mosaic_0001>
module attributes {stable_mosaic.version = 11 : i64} {
  func.func @_bn_stats_kernel(%arg0: memref<2x4x256xf32, #tpu.memory_space<vmem>>, %arg1: memref<4x1xf32, #tpu.memory_space<vmem>>, %arg2: memref<4x1xf32, #tpu.memory_space<vmem>>, %arg3: memref<4x1xf32, #tpu.memory_space<vmem>>, %arg4: memref<4x1xf32, #tpu.memory_space<vmem>>) attributes {dimension_semantics = [], scalar_prefetch = 0 : i64, scratch_operands = 0 : i64, tpu.core_type = #tpu.core_type<tc>} {
    %c0 = arith.constant 0 : index
    %c0_0 = arith.constant 0 : index
    %c0_1 = arith.constant 0 : index
    %0 = vector.load %arg0[%c0, %c0_0, %c0_1] : memref<2x4x256xf32, #tpu.memory_space<vmem>>, vector<2x4x256xf32>
    %cst = arith.constant dense<0.000000e+00> : vector<2x4xf32>
    %1 = vector.multi_reduction <add>, %0, %cst [2] : vector<2x4x256xf32> to vector<2x4xf32>
    %2 = vector.shape_cast %1 : vector<2x4xf32> to vector<2x4x1xf32>
    %3 = vector.extract_strided_slice %2 {offsets = [0, 0, 0], sizes = [1, 4, 1], strides = [1, 1, 1]} : vector<2x4x1xf32> to vector<1x4x1xf32>
    %4 = vector.shape_cast %3 : vector<1x4x1xf32> to vector<4x1xf32>
    %5 = vector.extract_strided_slice %2 {offsets = [1, 0, 0], sizes = [1, 4, 1], strides = [1, 1, 1]} : vector<2x4x1xf32> to vector<1x4x1xf32>
    %6 = vector.shape_cast %5 : vector<1x4x1xf32> to vector<4x1xf32>
    %7 = arith.addf %4, %6 : vector<4x1xf32>
    %cst_2 = arith.constant 0.001953125 : f32
    %8 = vector.broadcast %cst_2 : f32 to vector<4x1xf32>
    %9 = arith.mulf %7, %8 : vector<4x1xf32>
    %10 = vector.shape_cast %9 : vector<4x1xf32> to vector<1x4x1xf32>
    %11 = vector.broadcast %10 : vector<1x4x1xf32> to vector<2x4x256xf32>
    %12 = arith.subf %0, %11 : vector<2x4x256xf32>
    %13 = arith.mulf %12, %12 : vector<2x4x256xf32>
    %cst_3 = arith.constant dense<0.000000e+00> : vector<2x4xf32>
    %14 = vector.multi_reduction <add>, %13, %cst_3 [2] : vector<2x4x256xf32> to vector<2x4xf32>
    %15 = vector.shape_cast %14 : vector<2x4xf32> to vector<2x4x1xf32>
    %16 = vector.extract_strided_slice %15 {offsets = [0, 0, 0], sizes = [1, 4, 1], strides = [1, 1, 1]} : vector<2x4x1xf32> to vector<1x4x1xf32>
    %17 = vector.shape_cast %16 : vector<1x4x1xf32> to vector<4x1xf32>
    %18 = vector.extract_strided_slice %15 {offsets = [1, 0, 0], sizes = [1, 4, 1], strides = [1, 1, 1]} : vector<2x4x1xf32> to vector<1x4x1xf32>
    %19 = vector.shape_cast %18 : vector<1x4x1xf32> to vector<4x1xf32>
    %20 = arith.addf %17, %19 : vector<4x1xf32>
    %cst_4 = arith.constant 0.001953125 : f32
    %21 = vector.broadcast %cst_4 : f32 to vector<4x1xf32>
    %22 = arith.mulf %20, %21 : vector<4x1xf32>
    %c0_5 = arith.constant 0 : index
    %c0_6 = arith.constant 0 : index
    %23 = vector.load %arg1[%c0_5, %c0_6] : memref<4x1xf32, #tpu.memory_space<vmem>>, vector<4x1xf32>
    %cst_7 = arith.constant 9.99999974E-6 : f32
    %24 = vector.broadcast %cst_7 : f32 to vector<4x1xf32>
    %25 = arith.addf %22, %24 : vector<4x1xf32>
    %26 = math.rsqrt %25 : vector<4x1xf32>
    %27 = arith.mulf %23, %26 : vector<4x1xf32>
    %c0_8 = arith.constant 0 : index
    %c0_9 = arith.constant 0 : index
    %28 = vector.load %arg3[%c0_8, %c0_9] : memref<4x1xf32, #tpu.memory_space<vmem>>, vector<4x1xf32>
    tpu.vector_store %arg3[%c0_8, %c0_9], %27 {strides = array<i32>} : memref<4x1xf32, #tpu.memory_space<vmem>>, vector<4x1xf32>,
    %c0_10 = arith.constant 0 : index
    %c0_11 = arith.constant 0 : index
    %29 = vector.load %arg2[%c0_10, %c0_11] : memref<4x1xf32, #tpu.memory_space<vmem>>, vector<4x1xf32>
    %30 = arith.mulf %9, %27 : vector<4x1xf32>
    %31 = arith.subf %29, %30 : vector<4x1xf32>
    %c0_12 = arith.constant 0 : index
    %c0_13 = arith.constant 0 : index
    %32 = vector.load %arg4[%c0_12, %c0_13] : memref<4x1xf32, #tpu.memory_space<vmem>>, vector<4x1xf32>
    tpu.vector_store %arg4[%c0_12, %c0_13], %31 {strides = array<i32>} : memref<4x1xf32, #tpu.memory_space<vmem>>, vector<4x1xf32>,
    return
  }
}

</mosaic_0001>

<bundles_post_ra>
// kernel: tpu_custom_call.1
= control target key start
LH: loop header
LB: loop body
LE: loop exit
PB: predicated region body
PF: predicated region fallthrough
CT: control target
= control target key end

     0   :  { %10 = vsyncpa [#allocation3], 0  ;;  %s133_s15 = smov [#allocation2]   ;;  %s194_s0 = inlined_call_operand.hbm [shape: f32[2,4,256], index: 0, kind: input, shape index: {}]   ;;  %s195_s1 = inlined_call_operand.vmem [shape: f32[4,1], index: 1, kind: input, shape index: {}]   ;;  %s196_s2 = inlined_call_operand.vmem [shape: f32[4,1], index: 2, kind: input, shape index: {}]   ;;  %s197_s3 = inlined_call_operand.vmem [shape: f32[4,1], index: 3, kind: output, shape index: {0}]   ;;  %s198_s4 = inlined_call_operand.vmem [shape: f32[4,1], index: 4, kind: output, shape index: {1}]  }
   0x1   :  { %s16_s16 = sshll.u32 %s133_s15, 4  ;;  %s109_s19 = scalar_lea.hbm %s194_s0, 256  ;;  %s17_s16 = int_to_ptr.vmem [resolvable:$true] %s16_s16 }
   0x2   :  { %p110_p0 = scmp.ne.s32.totalorder %s194_s0, %s109_s19  ;;  %p113_p1 = scmp.lt.u32.totalorder %s109_s19, %s194_s0 }
   0x4   :  { %p115_p2 = pnand %p113_p1, %p110_p0 }
   0x6   :  { %118 = shalt.err (!%p115_p2)
}
   0x7   :  { %s119_s24 = scalar_lea.vmem %s17_s16, 256  ;;  %p124_p4 = scmp.lt.s32.totalorder %s17_s16, %s17_s16 }
   0x8   :  { %p120_p3 = scmp.ne.s32.totalorder %s17_s16, %s119_s24  ;;  %p125_p5 = scmp.lt.s32.totalorder %s119_s24, %s119_s24 }
   0xa   :  { %p126_p6 = por %p125_p5, %p124_p4 }
   0xc   :  { %p127_p7 = pnand %p126_p6, %p120_p3 }
   0xe   :  { %130 = shalt.err (!%p127_p7)
}
   0xf   :  { %s134_s25 = smov 128   ;;  %s135_s26 = smov 8  }
  0x10   :  { %22 = dma.hbm_to_vmem [thread:$0]  %s194_s0, 256, %s17_s16, [#allocation3], %s134_s25, %s134_s25, %s135_s26  }
  0x11   :  { %131 = dma.done.wait [#allocation3], 256  }
  0x12   :  { %132 = vsyncadd [#allocation3], 4294967040  ;;  %vm38_vm0 = vcmask 1043456   ;;  %v30_v0 = vld [vmem:[#allocation2] sm:$0xff]  ;;  %v31_v1 = vld [vmem:[#allocation2 + $0x8] sm:$0xff]  ;;  %v55_v12 = vlaneseq  ;;  %vm86_vm1 = vcmask 3072  }
  0x13   :  { %v34_v2 = vcombine.high %v30_v0, %v30_v0  ;;  %v39_v3 = vsel %vm38_vm0, %v30_v0, 0.0  ;;  %v35_v4 = vcombine.high %v31_v1, %v31_v1  ;;  %v44_v6 = vsel %vm38_vm0, %v31_v1, 0.0  ;;  %v82_v38 = vld [vmem:[%s195_s1] sm:$0xf] }
  0x14   :  { %v136_v10 = vmov 839922192   ;;  %v56_v15 = vshrl.u32 %v55_v12, 7  ;;  %v88_v41 = vld [vmem:[%s196_s2] sm:$0xf] }
  0x15   :  { %v40_v5 = vsel %vm38_vm0, %v34_v2, 0.0  ;;  %v45_v7 = vsel %vm38_vm0, %v35_v4, 0.0  ;;  %v53_v11 = vunpack.c.l.s4 %v136_v10 }
  0x16   :  { %v41_v8 = vadd.f32 %v40_v5, %v39_v3  ;;  %v46_v9 = vadd.f32 %v45_v7, %v44_v6 }
  0x17   :  { %v54_v14 = vunpack.c.0.s8 %v53_v11 }
  0x18   :  { %42 = vadd.xlane.f32.xlu0 %v41_v8 }
  0x19   :  { %v57_v17 = vsub.s32 %v54_v14, %v56_v15 }
  0x1c   :  { %47 = vadd.xlane.f32.xlu0 %v46_v9 }
  0xa5   :  { %v43_v13 = vpop.xlane.xlu0 %42 }
  0xa9   :  { %v48_v16 = vpop.xlane.xlu0 %47 }
  0xaa   :  { %v49_v18 = vadd.f32 %v48_v16, %v43_v13 }
  0xac   :  { %v50_v19 = vmul.f32 0.001953125, %v49_v18 }
  0xae   :  { %v58_v20 = vrot.slane %v50_v19, %v57_v17 }
  0xb0   :  { %v60_v21 = vsub.f32 %v30_v0, %v58_v20  ;;  %v61_v22 = vsub.f32 %v31_v1, %v58_v20 }
  0xb2   :  { %v62_v23 = vmul.f32 %v60_v21, %v60_v21  ;;  %v63_v24 = vmul.f32 %v61_v22, %v61_v22 }
  0xb4   :  { %v66_v25 = vcombine.high %v62_v23, %v62_v23  ;;  %v67_v26 = vcombine.high %v63_v24, %v63_v24  ;;  %v70_v27 = vsel %vm38_vm0, %v62_v23, 0.0  ;;  %v75_v31 = vsel %vm38_vm0, %v63_v24, 0.0 }
  0xb6   :  { %v71_v28 = vsel %vm38_vm0, %v66_v25, 0.0  ;;  %v76_v30 = vsel %vm38_vm0, %v67_v26, 0.0 }
  0xb7   :  { %v72_v29 = vadd.f32 %v71_v28, %v70_v27  ;;  %v77_v32 = vadd.f32 %v76_v30, %v75_v31 }
  0xb9   :  { %73 = vadd.xlane.f32.xlu1 %v72_v29 }
  0xbd   :  { %78 = vadd.xlane.f32.xlu1 %v77_v32 }
 0x146   :  { %v74_v33 = vpop.xlane.xlu1 %73 }
 0x14a   :  { %v79_v34 = vpop.xlane.xlu1 %78 }
 0x14b   :  { %v80_v35 = vadd.f32 %v79_v34, %v74_v33 }
 0x14d   :  { %v81_v36 = vmul.f32 0.001953125, %v80_v35 }
 0x14f   :  { %v83_v37 = vadd.f32 1e-05, %v81_v36 }
 0x151   :  { %107 = vrsqrt.f32 %v83_v37 }
 0x15b   :  { %v108_v39 = vpop.eup %107 }
 0x15c   :  { %v85_v40 = vmul.f32 %v108_v39, %v82_v38 }
 0x15e   :  { %87 = vst.msk [vmem:[%s197_s3] sm:$0xf] %vm86_vm1, %v85_v40  ;;  %v89_v42 = vmul.f32 %v85_v40, %v50_v19 }
 0x160   :  { %v90_v43 = vsub.f32 %v88_v41, %v89_v42 }
 0x162   :  { %91 = vst.msk [vmem:[%s198_s4] sm:$0xf] %vm86_vm1, %v90_v43 }
 0x163   :  { %100 = vsyncpa [#allocation3], 1 }

</bundles_post_ra>
